<compile_context>
chip_gen: v6e
topology: v6e:2x2x1
jax: 0.10.0
libtpu: 0.0.40
codegen_flags: <defaults>
</compile_context>

<pallas_src>
import functools

import jax
import jax.numpy as jnp
from jax.experimental import pallas as pl
from jax.experimental.pallas import tpu as pltpu


def _round_up(x, m):
    return (x + m - 1) // m * m


# ----------------------- fused feature-extractor kernel --------------------- #

def _feature_kernel(patch_ref, w_stem_ref, b_stem_ref, w_head_ref, b_head_ref,
                    o_ref, *, m_img, tm, tiles_per_split, has_pad, bf16_sigmoid):
    """Grid = (batch, row_splits, row_tiles_per_split).

    Per tile: stem matmul -> SiLU -> head matmul -> SiLU -> sublane-dense partial pooled
    sum accumulated into the resident (8, feat_c) f32 output block (one block per
    (batch, split)); the wrapper finishes the 8 -> 1 reduce and the 1/m_img scale."""
    i = pl.program_id(2)

    @pl.when(i == 0)
    def _init():
        o_ref[...] = jnp.zeros_like(o_ref)

    # stem conv-as-matmul (BN scale folded into the weights), bias + SiLU in f32
    s = jnp.dot(patch_ref[...], w_stem_ref[...], preferred_element_type=jnp.float32)
    s = s + b_stem_ref[...]
    s = s * jax.nn.sigmoid(s)

    # head 1x1 conv (32 -> 1280), bias + SiLU
    h = jnp.dot(s.astype(w_head_ref.dtype), w_head_ref[...],
                preferred_element_type=jnp.float32)
    h = h + b_head_ref[...]
    if bf16_sigmoid:
        # v6e/v7x: bf16 EUP ~2x transcendental throughput on the dominant sigmoid
        h = h * jax.nn.sigmoid(h.astype(jnp.bfloat16)).astype(jnp.float32)
    else:
        # v5e: no bf16 EUP/VPU -> keep the f32 path
        h = h * jax.nn.sigmoid(h)

    feat_c = o_ref.shape[-1]

    def _accumulate(hh):
        # sublane-dense partial reduce (tm, C) -> (8, C): keeps the accumulator and its
        # stores 8-sublane dense; the final 8 -> 1 reduce happens in the wrapper.
        o_ref[...] += jnp.sum(hh.reshape(tm // 8, 8, feat_c), axis=0)

    if has_pad:
        # Mask padded rows, but only on the tiles that actually contain them (the N-1
        # leading tiles skip the iota + (tm,1280) select entirely).
        g = pl.program_id(1) * tiles_per_split + i          # global row-tile index
        tile_has_pad = (g + 1) * tm > m_img

        @pl.when(tile_has_pad)
        def _masked():
            row = g * tm + jax.lax.broadcasted_iota(jnp.int32, (tm, 1), 0)
            _accumulate(jnp.where(row < m_img, h, 0.0))

        @pl.when(jnp.logical_not(tile_has_pad))
        def _full():
            _accumulate(h)
    else:
        _accumulate(h)


# ----------------------------- classifier head ------------------------------ #

def _head_kernel(pooled_ref, w1_ref, b1_ref, w2_ref, b2_ref, o_ref):
    """Batched classifier head: Dropout(0.2)[eval => identity] -> Linear(1280,256)
    -> ReLU -> Linear(256, num_classes-padded-to-128)."""
    z = jnp.dot(pooled_ref[...], w1_ref[...], preferred_element_type=jnp.float32)
    z = jnp.maximum(z + b1_ref[...], 0.0)
    logits = jnp.dot(z.astype(w2_ref.dtype), w2_ref[...],
                     preferred_element_type=jnp.float32) + b2_ref[...]
    o_ref[...] = logits.astype(o_ref.dtype)


# --------------------------------- glue ------------------------------------ #

def _extract_patches_nhwc(x, ksize=3, stride=2, pad=1):
    """im2col for a 3x3/stride-2/pad-1 conv; K ordering is (kh, kw, cin)."""
    n, h, w, c = x.shape
    xp = jnp.pad(x, ((0, 0), (pad, pad), (pad, pad), (0, 0)))
    ho = (h + 2 * pad - ksize) // stride + 1
    wo = (w + 2 * pad - ksize) // stride + 1
    cols = []
    for dy in range(ksize):
        for dx in range(ksize):
            cols.append(xp[:, dy:dy + stride * ho:stride, dx:dx + stride * wo:stride, :])
    patches = jnp.concatenate(cols, axis=-1)               # (N, Ho, Wo, k*k*C)
    return patches.reshape(n, ho * wo, ksize * ksize * c), ho, wo


def _bf16_eup_supported():
    """bf16 transcendentals are a win on v6e/v7x only (v5e has no bf16 EUP/VPU)."""
    try:
        kind = jax.devices()[0].device_kind.lower()
    except Exception:
        return False
    return any(tag in kind for tag in ("v6", "v7", "7x"))


def breast_cancer_classifier_forward(x_nchw, params, *, row_tile=1024, row_splits=None):
    """Forward pass. Input is NCHW (PyTorch convention); output is (N, num_classes) f32."""
    n = x_nchw.shape[0]
    # cast to bf16 up front so the wrapper-side im2col writes half the HBM bytes
    x = jnp.transpose(x_nchw, (0, 2, 3, 1)).astype(jnp.bfloat16)   # NCHW -> NHWC

    patches, ho, wo = _extract_patches_nhwc(x)                     # (N, M, 27) bf16
    m_img = ho * wo
    k = patches.shape[-1]
    k_pad = _round_up(k, 8)                                        # 27 -> 32

    tm = _round_up(min(row_tile, _round_up(m_img, 8)), 8)
    if row_splits is None:
        # v7x has 2 TensorCores; a single-image batch cannot feed both via the batch
        # axis, so split the row-tile axis into core-parallel partial pools instead.
        row_splits = 2 if n == 1 else 1
    tiles = _round_up(pl.cdiv(m_img, tm), row_splits)
    tiles_per_split = tiles // row_splits
    m_pad = tiles * tm

    # single pad for both the row axis and the K axis (27 -> 32)
    patches = jnp.pad(patches, ((0, 0), (0, m_pad - m_img), (0, k_pad - k)))

    # --- parameters: fold BN scales into weights, pad, cast matmul inputs to bf16 ---
    w_stem = jnp.pad(params["w_stem"] * params["stem_scale"],
                     ((0, k_pad - k), (0, 0))).astype(jnp.bfloat16)          # (32, 32)
    b_stem = params["stem_bias"].astype(jnp.float32)                         # (1, 32)
    w_head = (params["w_head"] * params["head_scale"]).astype(jnp.bfloat16)  # (32, 1280)
    b_head = params["head_bias"].astype(jnp.float32)                         # (1, 1280)
    feat_c = w_head.shape[1]

    kernel = functools.partial(
        _feature_kernel, m_img=m_img, tm=tm, tiles_per_split=tiles_per_split,
        has_pad=(m_pad != m_img), bf16_sigmoid=_bf16_eup_supported())

    # larger row tiles need a bit more scoped VMEM for the (tm, 1280) f32 intermediates
    vmem_limit = (48 if tm >= 768 else 32) * 1024 * 1024

    pooled_parts = pl.pallas_call(
        kernel,
        out_shape=jax.ShapeDtypeStruct((n, row_splits, 8, feat_c), jnp.float32),
        grid_spec=pltpu.PrefetchScalarGridSpec(
            num_scalar_prefetch=0,
            grid=(n, row_splits, tiles_per_split),
            in_specs=[
                # row-tiled patches (double-buffered by the Pallas pipeline)
                pl.BlockSpec((None, tm, k_pad),
                             lambda b, s, i: (b, s * tiles_per_split + i, 0)),
                # weights / biases stay resident in VMEM across grid steps
                pl.BlockSpec(w_stem.shape, lambda b, s, i: (0, 0)),
                pl.BlockSpec(b_stem.shape, lambda b, s, i: (0, 0)),
                pl.BlockSpec(w_head.shape, lambda b, s, i: (0, 0)),
                pl.BlockSpec(b_head.shape, lambda b, s, i: (0, 0)),
            ],
            # (8, 1280) pooled-sum block stays resident across the row-tile axis and is
            # used directly as the accumulator (no separate scratch / finalize needed)
            out_specs=pl.BlockSpec((None, None, 8, feat_c),
                                   lambda b, s, i: (b, s, 0, 0)),
        ),
        compiler_params=pltpu.CompilerParams(
            dimension_semantics=("parallel", "parallel", "arbitrary"),
            vmem_limit_bytes=vmem_limit,
        ),
    )(patches, w_stem, b_stem, w_head, b_head)

    # global average pool: fold (row_splits, 8) partial sums; Dropout(0.2) = identity (eval)
    pooled = jnp.sum(pooled_parts, axis=(1, 2)) * jnp.float32(1.0 / m_img)   # (N, 1280)

    # --- classifier head as one small batched matmul kernel (better MXU shape than the
    #     previous per-image M=1 matmul inside the feature kernel's finalize) ---
    num_classes = params["w2"].shape[1]
    c_pad = 128                                            # lane-dense logits
    n_pad = _round_up(n, 8)                                # sublane-dense rows

    pooled_b = jnp.pad(pooled, ((0, n_pad - n), (0, 0))).astype(jnp.bfloat16)
    w1 = params["w1"].astype(jnp.bfloat16)                                   # (1280, 256)
    b1 = params["b1"].astype(jnp.float32)                                    # (1, 256)
    w2 = jnp.pad(params["w2"], ((0, 0), (0, c_pad - num_classes))).astype(jnp.bfloat16)
    b2 = jnp.pad(params["b2"], ((0, 0), (0, c_pad - num_classes))).astype(jnp.float32)

    logits = pl.pallas_call(
        _head_kernel,
        out_shape=jax.ShapeDtypeStruct((n_pad, c_pad), jnp.float32),
        grid=(1,),
        in_specs=[
            pl.BlockSpec((n_pad, feat_c), lambda i: (0, 0)),
            pl.BlockSpec(w1.shape, lambda i: (0, 0)),
            pl.BlockSpec(b1.shape, lambda i: (0, 0)),
            pl.BlockSpec(w2.shape, lambda i: (0, 0)),
            pl.BlockSpec(b2.shape, lambda i: (0, 0)),
        ],
        out_specs=pl.BlockSpec((n_pad, c_pad), lambda i: (0, 0)),
    )(pooled_b, w1, b1, w2, b2)

    return logits[:n, :num_classes]


def _reference_forward(x_nchw, params):
    """Pure-JAX f32 reference for a sanity check."""
    x = jnp.transpose(x_nchw, (0, 2, 3, 1)).astype(jnp.float32)
    patches, _, _ = _extract_patches_nhwc(x)
    s = patches @ (params["w_stem"] * params["stem_scale"]) + params["stem_bias"]
    s = s * jax.nn.sigmoid(s)
    h = s @ (params["w_head"] * params["head_scale"]) + params["head_bias"]
    h = h * jax.nn.sigmoid(h)
    pooled = jnp.mean(h, axis=1)                          # Dropout(0.2) = identity (eval)
    z = jnp.maximum(pooled @ params["w1"] + params["b1"], 0.0)
    return z @ params["w2"] + params["b2"]


# --------------------------------- main ------------------------------------ #

if __name__ == "__main__":
    key = jax.random.PRNGKey(0)
    keys = jax.random.split(key, 11)

    N, CIN, H, W = 2, 3, 16, 16          # small RGB images (module expects 3-channel input)
    STEM_C, FEAT_C, HID, NUM_CLASSES = 32, 1280, 256, 2

    x = jax.random.normal(keys[0], (N, CIN, H, W), jnp.float32)

    params = {
        # stem 3x3 conv (K ordered as kh,kw,cin) + folded BN
        "w_stem":     jax.random.normal(keys[1], (3 * 3 * CIN, STEM_C), jnp.float32) * 0.1,
        "stem_scale": jax.random.uniform(keys[5], (1, STEM_C), jnp.float32, 0.5, 1.5),
        "stem_bias":  jax.random.normal(keys[6], (1, STEM_C), jnp.float32) * 0.05,
        # final 1x1 conv to 1280 features + folded BN
        "w_head":     jax.random.normal(keys[2], (STEM_C, FEAT_C), jnp.float32) * 0.1,
        "head_scale": jax.random.uniform(keys[7], (1, FEAT_C), jnp.float32, 0.5, 1.5),
        "head_bias":  jax.random.normal(keys[8], (1, FEAT_C), jnp.float32) * 0.05,
        # classifier head: Dropout(0.2) -> Linear(1280,256) -> ReLU -> Linear(256,2)
        "w1": jax.random.normal(keys[3], (FEAT_C, HID), jnp.float32) * 0.02,
        "b1": jax.random.normal(keys[9], (1, HID), jnp.float32) * 0.02,
        "w2": jax.random.normal(keys[4], (HID, NUM_CLASSES), jnp.float32) * 0.02,
        "b2": jnp.zeros((1, NUM_CLASSES), jnp.float32),
    }

    # case 1: batch=2, 16x16 -> m_img=64, row_tile=32 -> 2 row tiles/image:
    # exercises the cross-tile pooled accumulation path with no padded rows.
    logits = breast_cancer_classifier_forward(x, params, row_tile=32)
    logits = jax.block_until_ready(logits)
    assert logits.shape == (N, NUM_CLASSES) and logits.dtype == jnp.float32
    ref = _reference_forward(x, params)
    assert bool(jnp.all(jnp.isfinite(logits)))
    # generous tolerance: kernel uses bf16 matmul inputs (f32 accumulate)
    assert bool(jnp.allclose(logits, ref, rtol=0.2, atol=5e-2)), (logits, ref)

    # case 2: batch=1, 14x14 -> m_img=49: exercises the gated padded-row mask
    # (including a fully-padded tile) and the default row_splits=2 megacore path.
    x2 = jax.random.normal(keys[10], (1, CIN, 14, 14), jnp.float32)
    logits2 = breast_cancer_classifier_forward(x2, params)
    logits2 = jax.block_until_ready(logits2)
    assert logits2.shape == (1, NUM_CLASSES)
    ref2 = _reference_forward(x2, params)
    assert bool(jnp.all(jnp.isfinite(logits2)))
    assert bool(jnp.allclose(logits2, ref2, rtol=0.2, atol=5e-2)), (logits2, ref2)

    print("KERNEL_OK")
</pallas_src>

<mosaic_0001>
module attributes {stable_mosaic.version = 11 : i64} {
  func.func @_feature_kernel(%arg0: i32, %arg1: i32, %arg2: i32, %arg3: memref<1x32x32xbf16, #tpu.memory_space<vmem>>, %arg4: memref<32x32xbf16, #tpu.memory_space<vmem>>, %arg5: memref<1x32xf32, #tpu.memory_space<vmem>>, %arg6: memref<32x1280xbf16, #tpu.memory_space<vmem>>, %arg7: memref<1x1280xf32, #tpu.memory_space<vmem>>, %arg8: memref<1x1x8x1280xf32, #tpu.memory_space<vmem>>) attributes {dimension_semantics = [#tpu.dimension_semantics<parallel>, #tpu.dimension_semantics<parallel>, #tpu.dimension_semantics<arbitrary>], iteration_bounds = array<i64: 2, 1, 2>, scalar_prefetch = 0 : i64, scratch_operands = 0 : i64, tpu.core_type = #tpu.core_type<tc>, window_params = [{transform_indices = @transform_0, window_bounds = array<i64: 1, 32, 32>}, {pipeline_mode = #tpu.pipeline_mode<synchronous>, transform_indices = @transform_1, window_bounds = array<i64: 32, 32>}, {pipeline_mode = #tpu.pipeline_mode<synchronous>, transform_indices = @transform_2, window_bounds = array<i64: 1, 32>}, {pipeline_mode = #tpu.pipeline_mode<synchronous>, transform_indices = @transform_3, window_bounds = array<i64: 32, 1280>}, {pipeline_mode = #tpu.pipeline_mode<synchronous>, transform_indices = @transform_4, window_bounds = array<i64: 1, 1280>}, {transform_indices = @transform_5, window_bounds = array<i64: 1, 1, 8, 1280>}]} {
    %c0_i32 = arith.constant 0 : i32
    %0 = arith.cmpi eq, %arg2, %c0_i32 : i32
    %1 = arith.extui %0 : i1 to i32
    %c0_i32_0 = arith.constant 0 : i32
    %2 = arith.cmpi ne, %1, %c0_i32_0 : i32
    scf.if %2 {
      %cst_23 = arith.constant 0.000000e+00 : f32
      %36 = vector.broadcast %cst_23 : f32 to vector<8x1280xf32>
      %c0_24 = arith.constant 0 : index
      %c0_25 = arith.constant 0 : index
      %c0_26 = arith.constant 0 : index
      %c0_27 = arith.constant 0 : index
      %37 = vector.load %arg8[%c0_24, %c0_25, %c0_26, %c0_27] : memref<1x1x8x1280xf32, #tpu.memory_space<vmem>>, vector<1x1x8x1280xf32>
      %38 = vector.shape_cast %37 : vector<1x1x8x1280xf32> to vector<8x1280xf32>
      %39 = vector.shape_cast %36 : vector<8x1280xf32> to vector<1x1x8x1280xf32>
      tpu.vector_store %arg8[%c0_24, %c0_25, %c0_26, %c0_27], %39 {strides = array<i32>} : memref<1x1x8x1280xf32, #tpu.memory_space<vmem>>, vector<1x1x8x1280xf32>,
    } else {
    }
    %c0 = arith.constant 0 : index
    %c0_1 = arith.constant 0 : index
    %c0_2 = arith.constant 0 : index
    %3 = vector.load %arg3[%c0, %c0_1, %c0_2] : memref<1x32x32xbf16, #tpu.memory_space<vmem>>, vector<1x32x32xbf16>
    %4 = vector.shape_cast %3 : vector<1x32x32xbf16> to vector<32x32xbf16>
    %c0_3 = arith.constant 0 : index
    %c0_4 = arith.constant 0 : index
    %5 = vector.load %arg4[%c0_3, %c0_4] : memref<32x32xbf16, #tpu.memory_space<vmem>>, vector<32x32xbf16>
    %cst = arith.constant dense<0.000000e+00> : vector<32x32xf32>
    %6 = tpu.matmul %4, %5, %cst {dimension_numbers = #tpu.dot_dimension_numbers<[1], [0], [0], [1], [0, 0, 1, 1], [], []>} : vector<32x32xbf16>, vector<32x32xbf16>, vector<32x32xf32> -> vector<32x32xf32>
    %c0_5 = arith.constant 0 : index
    %c0_6 = arith.constant 0 : index
    %7 = vector.load %arg5[%c0_5, %c0_6] : memref<1x32xf32, #tpu.memory_space<vmem>>, vector<1x32xf32>
    %8 = vector.broadcast %7 : vector<1x32xf32> to vector<32x32xf32>
    %9 = arith.addf %6, %8 : vector<32x32xf32>
    %10 = arith.negf %9 : vector<32x32xf32>
    %11 = math.exp %10 : vector<32x32xf32>
    %cst_7 = arith.constant 1.000000e+00 : f32
    %12 = vector.broadcast %cst_7 : f32 to vector<32x32xf32>
    %13 = arith.addf %12, %11 : vector<32x32xf32>
    %14 = arith.divf %12, %13 : vector<32x32xf32>
    %15 = arith.mulf %9, %14 : vector<32x32xf32>
    %16 = arith.truncf %15 : vector<32x32xf32> to vector<32x32xbf16>
    %c0_8 = arith.constant 0 : index
    %c0_9 = arith.constant 0 : index
    %17 = vector.load %arg6[%c0_8, %c0_9] : memref<32x1280xbf16, #tpu.memory_space<vmem>>, vector<32x1280xbf16>
    %cst_10 = arith.constant dense<0.000000e+00> : vector<32x1280xf32>
    %18 = tpu.matmul %16, %17, %cst_10 {dimension_numbers = #tpu.dot_dimension_numbers<[1], [0], [0], [1], [0, 0, 1, 1], [], []>} : vector<32x32xbf16>, vector<32x1280xbf16>, vector<32x1280xf32> -> vector<32x1280xf32>
    %c0_11 = arith.constant 0 : index
    %c0_12 = arith.constant 0 : index
    %19 = vector.load %arg7[%c0_11, %c0_12] : memref<1x1280xf32, #tpu.memory_space<vmem>>, vector<1x1280xf32>
    %20 = vector.broadcast %19 : vector<1x1280xf32> to vector<32x1280xf32>
    %21 = arith.addf %18, %20 : vector<32x1280xf32>
    %22 = arith.negf %21 : vector<32x1280xf32>
    %23 = math.exp %22 : vector<32x1280xf32>
    %cst_13 = arith.constant 1.000000e+00 : f32
    %24 = vector.broadcast %cst_13 : f32 to vector<32x1280xf32>
    %25 = arith.addf %24, %23 : vector<32x1280xf32>
    %26 = arith.divf %24, %25 : vector<32x1280xf32>
    %27 = arith.mulf %21, %26 : vector<32x1280xf32>
    %c0_14 = arith.constant 0 : index
    %c0_15 = arith.constant 0 : index
    %c0_16 = arith.constant 0 : index
    %c0_17 = arith.constant 0 : index
    %28 = vector.load %arg8[%c0_14, %c0_15, %c0_16, %c0_17] : memref<1x1x8x1280xf32, #tpu.memory_space<vmem>>, vector<1x1x8x1280xf32>
    %29 = vector.shape_cast %28 : vector<1x1x8x1280xf32> to vector<8x1280xf32>
    %30 = vector.shape_cast %27 : vector<32x1280xf32> to vector<4x8x1280xf32>
    %cst_18 = arith.constant dense<0.000000e+00> : vector<8x1280xf32>
    %31 = vector.multi_reduction <add>, %30, %cst_18 [0] : vector<4x8x1280xf32> to vector<8x1280xf32>
    %32 = arith.addf %29, %31 : vector<8x1280xf32>
    %c0_19 = arith.constant 0 : index
    %c0_20 = arith.constant 0 : index
    %c0_21 = arith.constant 0 : index
    %c0_22 = arith.constant 0 : index
    %33 = vector.load %arg8[%c0_19, %c0_20, %c0_21, %c0_22] : memref<1x1x8x1280xf32, #tpu.memory_space<vmem>>, vector<1x1x8x1280xf32>
    %34 = vector.shape_cast %33 : vector<1x1x8x1280xf32> to vector<8x1280xf32>
    %35 = vector.shape_cast %32 : vector<8x1280xf32> to vector<1x1x8x1280xf32>
    tpu.vector_store %arg8[%c0_19, %c0_20, %c0_21, %c0_22], %35 {strides = array<i32>} : memref<1x1x8x1280xf32, #tpu.memory_space<vmem>>, vector<1x1x8x1280xf32>,
    return
  }
  func.func @transform_0(%arg0: i32, %arg1: i32, %arg2: i32) -> (i32, i32, i32) {
    %c2_i32 = arith.constant 2 : i32
    %0 = arith.muli %arg1, %c2_i32 : i32
    %1 = arith.addi %0, %arg2 : i32
    %c0_i32 = arith.constant 0 : i32
    %c0_i32_0 = arith.constant 0 : i32
    return %arg0, %1, %c0_i32 : i32, i32, i32
  }
  func.func @transform_1(%arg0: i32, %arg1: i32, %arg2: i32) -> (i32, i32) {
    %c0_i32 = arith.constant 0 : i32
    %c0_i32_0 = arith.constant 0 : i32
    %c0_i32_1 = arith.constant 0 : i32
    return %c0_i32, %c0_i32_0 : i32, i32
  }
  func.func @transform_2(%arg0: i32, %arg1: i32, %arg2: i32) -> (i32, i32) {
    %c0_i32 = arith.constant 0 : i32
    %c0_i32_0 = arith.constant 0 : i32
    %c0_i32_1 = arith.constant 0 : i32
    return %c0_i32, %c0_i32_0 : i32, i32
  }
  func.func @transform_3(%arg0: i32, %arg1: i32, %arg2: i32) -> (i32, i32) {
    %c0_i32 = arith.constant 0 : i32
    %c0_i32_0 = arith.constant 0 : i32
    %c0_i32_1 = arith.constant 0 : i32
    return %c0_i32, %c0_i32_0 : i32, i32
  }
  func.func @transform_4(%arg0: i32, %arg1: i32, %arg2: i32) -> (i32, i32) {
    %c0_i32 = arith.constant 0 : i32
    %c0_i32_0 = arith.constant 0 : i32
    %c0_i32_1 = arith.constant 0 : i32
    return %c0_i32, %c0_i32_0 : i32, i32
  }
  func.func @transform_5(%arg0: i32, %arg1: i32, %arg2: i32) -> (i32, i32, i32, i32) {
    %c0_i32 = arith.constant 0 : i32
    %c0_i32_0 = arith.constant 0 : i32
    %c0_i32_1 = arith.constant 0 : i32
    return %arg0, %arg1, %c0_i32, %c0_i32_0 : i32, i32, i32, i32
  }
}

</mosaic_0001>

<bundles_post_ra>
// kernel: tpu_custom_call.1
= control target key start
LH: loop header
LB: loop body
LE: loop exit
PB: predicated region body
PF: predicated region fallthrough
CT: control target
= control target key end

     0   :  { %10 = vsyncpa [#allocation3], 0  ;;  %s2339_s0 = inlined_call_operand.vmem [shape: bf16[2,64,32], index: 0, kind: input, shape index: {}]   ;;  %s2340_s1 = inlined_call_operand.vmem [shape: bf16[32,32], index: 1, kind: input, shape index: {}]   ;;  %s2341_s2 = inlined_call_operand.vmem [shape: f32[1,32], index: 2, kind: input, shape index: {}]   ;;  %s2342_s3 = inlined_call_operand.hbm [shape: bf16[32,1280], index: 3, kind: input, shape index: {}]   ;;  %s2343_s4 = inlined_call_operand.vmem [shape: f32[1,1280], index: 4, kind: input, shape index: {}]   ;;  %s2344_s5 = inlined_call_operand.hbm [shape: f32[2,1,8,1280], index: 5, kind: output, shape index: {}]  }
   0x1   :  { %11 = vsyncpa [#allocation4], 0 }
   0x2   :  { %13 = vsyncpa [#allocation4 + $0x1], 0  ;;  %s1888_s18 = smov 0   ;;  %s1890_s19 = smov 0  }
   0x3   :  { %s1892_s20 = smov 0   ;;  %s1894_s21 = smov 0  }
   0x4   :  { %s1896_s22 = smov 0   ;;  %s1898_s23 = smov 0  }
   0x5   :  { %s1900_s24 = smov 0   ;;  %s1902_s25 = smov 0  }
   0x6 LB: > { %s1323_s26 = sadd.s32 4294967295, %s1850_s25   ;;  %s1324_s27 = sadd.s32 4294967294, %s1850_s25   ;;  %s1850_s25 = sphi %s1902_s25, %s19_s25   ;;  %s1846_s24 = sphi %s1900_s24, %s2360_s24   ;;  %s1842_s23 = sphi %s1898_s23, %s2359_s23   ;;  %s1838_s22 = sphi %s1896_s22, %s2358_s22   ;;  %s1834_s21 = sphi %s1894_s21, %s2357_s21   ;;  %s1830_s20 = sphi %s1892_s20, %s2356_s20   ;;  %s1826_s19 = sphi %s1890_s19, %s2355_s19   ;;  %s1822_s18 = sphi %s1888_s18, %s2354_s18  }
   0x7   : > { %s31_s28 = sadd.s32 1, %s1842_s23  ;;  %s38_s29 = sadd.s32 1, %s1846_s24 }
   0x8   : > { %p32_p0 = scmp.ge.s32.totalorder %s31_s28, 2  ;;  %s163_s30 = sadd.s32 1, %s1830_s20 }
   0x9   : > { %p173_p1 = scmp.ne.s32.totalorder %s1830_s20, %s1826_s19  ;;  %p174_p2 = scmp.eq.s32.totalorder %s1323_s26, 3 }
   0xa   : > { %s2362_s28 = smov (%p32_p0, %s31_s28), 0  ;;  %s2364_s29 = smov (!%p32_p0, %s38_s29), %s1846_s24 }
   0xb   : > { %p1938_p3 = por %p174_p2, %p173_p1  ;;  %p179_p4 = scmp.ne.s32.totalorder %s1826_s19, %s1822_s18 }
   0xc   : > { %p40_p5 = scmp.ge.s32.totalorder %s2364_s29, 2  ;;  %p180_p6 = scmp.eq.s32.totalorder %s1324_s27, 3 }
   0xd   : > { %p1325_p7 = scmp.ge.s32.totalorder %s1850_s25, 1  ;;  %p187_p8 = scmp.lt.s32.totalorder %s1850_s25, 5 }
   0xe   : > { %s2366_s29 = smov (%p40_p5, %s2364_s29), 0  ;;  %p1948_p9 = por %p180_p6, %p179_p4 }
   0xf   : > { %p1952_p10 = pnand %p1325_p7, %p187_p8  ;;  %s158_s9 = ssub.s32 %s1846_s24, %s2366_s29 }
  0x10   : > { %p161_p11 = scmp.eq.s32.totalorder %s158_s9, 0  ;;  %p1960_p13 = scmp.eq.s32.totalorder %s1323_s26, 0 }
  0x11   : > { %p1438_p12 = pneg %p1952_p10  ;;  %s1852_s12 = smov [#allocation2]  }
  0x12   : > { %s1965_s11 = scalar_select %p161_p11, %s1830_s20, %s163_s30  }
  0x13   : > { %s205_s13 = sshll.u32 %s1852_s12, 4  ;;  %p1969_p0 = pnand %p1960_p13, %p1438_p12  ;;  %s206_s13 = int_to_ptr.vmem [resolvable:$true] %s205_s13 }
  0x14   : > { %s1739_s15 = scalar_lea.vmem %s206_s13, 2560  ;;  %p1747_p6 = scmp.lt.s32.totalorder %s206_s13, %s206_s13 }
  0x15   : > { %p1730_p1 = pneg %p1969_p0  ;;  %p1740_p2 = scmp.ne.s32.totalorder %s206_s13, %s1739_s15 }
  0x16   : > { %p1748_p7 = scmp.lt.s32.totalorder %s1739_s15, %s1739_s15 }
  0x17   : > { %p1742_p4 = pnand %p1740_p2, %p1730_p1 }
  0x18   : > { %p1749_p8 = por %p1748_p7, %p1747_p6 }
  0x19   : > { %p1743_p5 = pneg %p1742_p4 }
  0x1b   : > { %p1750_p11 = pnand %p1749_p8, %p1743_p5 }
  0x1d   : > { %1753 = shalt.err (!%p1750_p11)
}
  0x1e   : > { %s1853_s16 = smov 640   ;;  %s1854_s17 = smov 40  }
  0x1f   : > { %1441 = dma.hbm_to_vmem [thread:$0]  (!%p1969_p0), %s2342_s3, 2560, %s206_s13, [#allocation3], %s1853_s16, %s1853_s16, %s1854_s17  }
  0x20   : > { %241 = sbr.rel (%p1952_p10) target bundleno = 617 (0x269), region = 40 }
  0x25   : > { %1813 = dma.done.wait (%p1960_p13), [#allocation3], 2560  }
  0x26   : > { %1815 = vsyncadd (%p1960_p13), [#allocation3], 4294964736  ;;  %s272_s30 = sand.u32 1, %s1826_s19   ;;  %s1330_s9 = sshll.u32 %s1834_s21, 2 }
  0x27   : > { %s1430_s12 = smul.u32 80, %s272_s30  ;;  %p278_p12 = scmp.lt.s32.totalorder %s1838_s22, 1 }
  0x28   : > { %p280_p0 = scmp.lt.s32.totalorder %s1330_s9, 7  ;;  %p1333_p10 = scmp.ne.s32.totalorder %s1834_s21, 0 }
  0x29   : > { %s279_s13 = scalar_select %p278_p12, %s1838_s22, 1 }
  0x2a   : > { %s2368_s9 = smov (!%p280_p0, %s1330_s9), 7  ;;  %s1995_s26 = scalar_lea.vmem [#allocation5], %s1430_s12 }
  0x2b   : > { %s1331_s8 = sshll.u32 %s279_s13, 3  ;;  %293 = sbr.rel (%p1333_p10) target bundleno = 54 (0x36), region = 48 }
  0x2c   : > { %s283_s14 = sadd.s32 %s1331_s8, %s2368_s9 }
  0x2d   : > { %s1332_s15 = sshll.u32 %s283_s14, 2 }
  0x2e   : > { %s285_s10 = scalar_lea.vmem %s2339_s0, %s1332_s15 }
  0x30   : > { %v1855_v0 = vmov 0.0  }
  0x31   : > { %294 = vst [vmem:[%s1995_s26] sm:$0xff] %v1855_v0  ;;  %295 = vst [vmem:[%s1995_s26 + $0x8] sm:$0xff] %v1855_v0 }
  0x32   : > { %296 = vst [vmem:[%s1995_s26 + $0x10] sm:$0xff] %v1855_v0  ;;  %297 = vst [vmem:[%s1995_s26 + $0x18] sm:$0xff] %v1855_v0 }
  0x33   : > { %298 = vst [vmem:[%s1995_s26 + $0x20] sm:$0xff] %v1855_v0  ;;  %299 = vst [vmem:[%s1995_s26 + $0x28] sm:$0xff] %v1855_v0 }
  0x34   : > { %300 = vst [vmem:[%s1995_s26 + $0x30] sm:$0xff] %v1855_v0  ;;  %301 = vst [vmem:[%s1995_s26 + $0x38] sm:$0xff] %v1855_v0 }
  0x35   : > { %302 = vst [vmem:[%s1995_s26 + $0x40] sm:$0xff] %v1855_v0  ;;  %303 = vst [vmem:[%s1995_s26 + $0x48] sm:$0xff] %v1855_v0 }
  0x36 PF: > { %v1518_v1 = vld [vmem:[%s2340_s1 + $0x8] sm:$0xff]   ;;  %v1519_v2 = vld [vmem:[%s2340_s1] sm:$0xff]   ;;  %vm341_vm0 = vcmask 261120   ;;  %v1522_v5 = vld [vmem:[#allocation2 + $0x54] ss:$40 sps:$4 sm:$0xff]   ;;  %v1856_v14 = vmov 0   ;;  %v451_v57 = vlaneseq }
  0x37   : > { %1422 = vmatprep.subr.bf16.mxu0 %v1518_v1  ;;  %v1520_v3 = vld [vmem:[%s285_s10] sm:$0xff]   ;;  %v1521_v4 = vld [vmem:[%s285_s10 + $0x8] sm:$0xff]   ;;  %v1524_v7 = vld [vmem:[#allocation2 + $0x50] ss:$40 sps:$4 sm:$0xff]   ;;  %619 = vmatprep.subr.bf16.mxu1 %v1522_v5  ;;  %s1431_s10 = smul.u32 1280, %s1838_s22  ;;  %s1229_s21 = sshll.u32 %s1995_s26, 4  ;;  %s1230_s21 = int_to_ptr.vmem [resolvable:$true] %s1229_s21 }
  0x38   : > { %1423 = vmatpush3.bf16.msra.mxu0 %v1518_v1  ;;  %1426 = vmatprep.mubr.msk.bf16.mxu0 %vm341_vm0, %v1520_v3  ;;  %v1527_v6 = vld [vmem:[#allocation2 + $0x5c] ss:$40 sps:$4 sm:$0xff]   ;;  %v1525_v8 = vld [vmem:[#allocation2 + $0x58] ss:$40 sps:$4 sm:$0xff]   ;;  %v1533_v10 = vld [vmem:[#allocation2 + $0xc] ss:$40 sps:$4 sm:$0xff]  }
  0x39   : > { %1424 = vmatprep.subr.bf16.mxu0 %v1519_v2  ;;  %620 = vmatpush1.bf16.msra.mxu1 %v1524_v7  ;;  %v1528_v9 = vld [vmem:[#allocation2 + $0x4] ss:$40 sps:$4 sm:$0xff]   ;;  %v1530_v11 = vld [vmem:[#allocation2] ss:$40 sps:$4 sm:$0xff]   ;;  %v1539_v43 = vld [vmem:[#allocation2 + $0x14] ss:$40 sps:$4 sm:$0xff]   ;;  %s2289_s12 = scalar_lea.hbm %s2344_s5, %s1431_s10 }
  0x3a   : > { %v1531_v12 = vld [vmem:[#allocation2 + $0x8] ss:$40 sps:$4 sm:$0xff]   ;;  %621 = vmatprep.subr.bf16.mxu1 %v1528_v9  ;;  %v1536_v13 = vld [vmem:[#allocation2 + $0x64] ss:$40 sps:$4 sm:$0xff]   ;;  %639 = vmatprep.mubr.bf16.mxu1 %v1856_v14  ;;  %v1334_v17 = vld [vmem:[%s2341_s2] ss:$0 sm:$0xff] }
  0x3b   : > { %v1542_v15 = vld [vmem:[#allocation2 + $0x6c] ss:$40 sps:$4 sm:$0xff]   ;;  %v1534_v41 = vld [vmem:[#allocation2 + $0x60] ss:$40 sps:$4 sm:$0xff]   ;;  %v1545_v46 = vld [vmem:[#allocation2 + $0x1c] ss:$40 sps:$4 sm:$0xff]  }
  0x3c   : > { %1425 = vmatpush3.bf16.msra.mxu0 %v1519_v2  ;;  %v1540_v45 = vld [vmem:[#allocation2 + $0x68] ss:$40 sps:$4 sm:$0xff]   ;;  %v1548_v50 = vld [vmem:[#allocation2 + $0x74] ss:$40 sps:$4 sm:$0xff]   ;;  %v1543_v51 = vld [vmem:[#allocation2 + $0x18] ss:$40 sps:$4 sm:$0xff]  }
  0x3d   : > { %672 = vmatprep.subr.bf16.mxu0 %v1527_v6  ;;  %622 = vmatpush1.bf16.msra.mxu1 %v1530_v11  ;;  %v1537_v48 = vld [vmem:[#allocation2 + $0x10] ss:$40 sps:$4 sm:$0xff]   ;;  %v1551_v55 = vld [vmem:[#allocation2 + $0x24] ss:$40 sps:$4 sm:$0xff]   ;;  %v1549_v56 = vld [vmem:[#allocation2 + $0x20] ss:$40 sps:$4 sm:$0xff]  }
  0x3e   : > { %725 = vmatprep.subr.bf16.mxu1 %v1536_v13  ;;  %v1546_v54 = vld [vmem:[#allocation2 + $0x70] ss:$40 sps:$4 sm:$0xff]   ;;  %v2039_v58 = vshrl.u32 %v451_v57, 7  ;;  %v2046_v61 = vld [vmem:[%s2343_s4] sm:$0xff]  ;;  %s1213_s13 = scalar_lea.sflag [#allocation4], %s272_s30  ;;  %s1754_s8 = scalar_lea.vmem %s1230_s21, 1280 }
  0x3f   : > { %1427 = vmatmul.mubr.msk.bf16.vlgmr.msra.gmra.mxu0 %vm341_vm0, %v1521_v4  ;;  %p1755_p13 = scmp.ne.s32.totalorder %s1230_s21, %s1754_s8  ;;  %s1857_s22 = smov [#allocation5]  }
  0x40   : > { %673 = vmatpush1.bf16.msra.mxu0 %v1525_v8  ;;  %692 = vmatprep.mubr.bf16.mxu0 %v1856_v14  ;;  %v2346_v59 = vsub.s32 0, %v2039_v58  ;;  %v461_v60 = vsub.s32 2, %v2039_v58  ;;  %v2345_v62 = vsub.s32 1, %v2039_v58  ;;  %v465_v63 = vsub.s32 3, %v2039_v58  ;;  %s1758_s14 = sshll.u32 %s1857_s22, 4  ;;  %s1759_s14 = int_to_ptr.vmem [resolvable:$false] %s1758_s14 }
  0x41   : > { %674 = vmatprep.subr.bf16.mxu0 %v1533_v10  ;;  %p1756_p1 = pnand %p1755_p13, %p1938_p3  ;;  %s1760_s15 = scalar_lea.vmem %s1759_s14, 2560 }
  0x42   : > { %v454_v0 = vrot.slane %v2046_v61, %v2346_v59  ;;  %v462_v1 = vrot.slane %v2046_v61, %v461_v60  ;;  %v458_v2 = vrot.slane %v2046_v61, %v2345_v62  ;;  %v466_v3 = vrot.slane %v2046_v61, %v465_v63  ;;  %p1761_p4 = scmp.lt.s32.totalorder %s1230_s21, %s1759_s14  ;;  %p1762_p5 = scmp.lt.s32.totalorder %s1760_s15, %s1754_s8 }
  0x43   : > { %p1757_p2 = pneg %p1756_p1 }
  0x44   : > { %675 = vmatpush1.bf16.msra.mxu0 %v1531_v12  ;;  %p1763_p6 = por %p1762_p5, %p1761_p4 }
  0x45   : > { %778 = vmatprep.subr.bf16.mxu0 %v1542_v15 }
  0x46   : > { %p1764_p7 = pnand %p1763_p6, %p1757_p2 }
  0xff   : > { %v1428_v16 = vpop.f32.mrf.mxu0 }
 0x100   : > { %v391_v21 = vadd.f32 %v1428_v16, %v1334_v17 }
 0x101   : > { %v382_v18 = vpop.f32.mrf.mxu0 }
 0x102   : > { %v383_v19 = vadd.f32 %v1334_v17, %v382_v18  ;;  %v1343_v27 = vmul.f32 -1.442695, %v391_v21 }
 0x103   : > { %v1429_v20 = vpop.f32.mrf.mxu0 }
 0x104   : > { %v1341_v22 = vmul.f32 -1.442695, %v383_v19  ;;  %v394_v23 = vadd.f32 %v1429_v20, %v1334_v17 }
 0x105   : > { %v385_v24 = vpop.f32.mrf.mxu0 }
 0x106   : > { %1552 = vpow2.f32 %v1341_v22  ;;  %v1344_v25 = vmul.f32 -1.442695, %v394_v23  ;;  %v386_v26 = vadd.f32 %v1334_v17, %v385_v24 }
 0x108   : > { %v1342_v28 = vmul.f32 -1.442695, %v386_v26  ;;  %1554 = vpow2.f32 %v1344_v25 }
 0x10a   : > { %1556 = vpow2.f32 %v1342_v28 }
 0x10b   : > { %1558 = vpow2.f32 %v1343_v27 }
 0x113   : > { %v1553_v29 = vpop.eup %1552 }
 0x114   : > { %v409_v30 = vadd.f32 1.0, %v1553_v29 }
 0x115   : > { %v1555_v31 = vpop.eup %1554 }
 0x116   : > { %1560 = vrcp.f32 %v409_v30  ;;  %v412_v35 = vadd.f32 1.0, %v1555_v31 }
 0x117   : > { %v1557_v32 = vpop.eup %1556 }
 0x118   : > { %v410_v33 = vadd.f32 1.0, %v1557_v32  ;;  %v1559_v34 = vpop.eup %1558 }
 0x119   : > { %v411_v36 = vadd.f32 1.0, %v1559_v34 }
 0x11a   : > { %1562 = vrcp.f32 %v410_v33 }
 0x11b   : > { %1564 = vrcp.f32 %v412_v35 }
 0x11c   : > { %1566 = vrcp.f32 %v411_v36 }
 0x123   : > { %v1561_v37 = vpop.eup %1560 }
 0x124   : > { %v421_v39 = vmul.f32 %v1561_v37, %v383_v19 }
 0x127   : > { %v1563_v38 = vpop.eup %1562 }
 0x128   : > { %v422_v40 = vmul.f32 %v1563_v38, %v386_v26  ;;  %v1565_v44 = vpop.eup %1564 }
 0x129   : > { %v1567_v47 = vpop.eup %1566  ;;  %v424_v49 = vmul.f32 %v1565_v44, %v394_v23 }
 0x12a   : > { %v425_v42 = vpack.c.bf16 %v422_v40, %v421_v39  ;;  %v423_v52 = vmul.f32 %v1567_v47, %v391_v21 }
 0x12c   : > { %1365 = vmatmul.mubr.msk.bf16.vlgmr.msra.gmra.mxu1 %vm341_vm0, %v425_v42  ;;  %1367 = vmatmul.mubr.msk.bf16.vlgmr.msra.gmra.mxu0 %vm341_vm0, %v425_v42  ;;  %v426_v53 = vpack.c.bf16 %v424_v49, %v423_v52 }
 0x12d   : > { %726 = vmatpush1.bf16.msra.mxu1 %v1534_v41  ;;  %649 = vmatprep.mubr.bf16.mxu1 %v1856_v14 }
 0x12e   : > { %702 = vmatprep.mubr.bf16.mxu0 %v1856_v14  ;;  %727 = vmatprep.subr.bf16.mxu1 %v1539_v43 }
 0x12f   : > { %779 = vmatpush1.bf16.msra.mxu0 %v1540_v45 }
 0x130   : > { %780 = vmatprep.subr.bf16.mxu0 %v1545_v46 }
 0x131   : > { %728 = vmatpush1.bf16.msra.mxu1 %v1537_v48 }
 0x132   : > { %831 = vmatprep.subr.bf16.mxu1 %v1548_v50 }
 0x133   : > { %781 = vmatpush1.bf16.msra.mxu0 %v1543_v51 }
 0x134   : > { %1366 = vmatmul.mubr.msk.bf16.gmra.mxu1 %vm341_vm0, %v426_v53  ;;  %1368 = vmatmul.mubr.msk.bf16.gmra.mxu0 %vm341_vm0, %v426_v53 }
 0x135   : > { %745 = vmatprep.mubr.bf16.mxu1 %v1856_v14  ;;  %798 = vmatprep.mubr.bf16.mxu0 %v1856_v14 }
 0x13c   : > { %1369 = vmatmul.mubr.msk.bf16.vlgmr.msra.gmra.mxu1 %vm341_vm0, %v425_v42  ;;  %1371 = vmatmul.mubr.msk.bf16.vlgmr.msra.gmra.mxu0 %vm341_vm0, %v425_v42 }
 0x13d   : > { %832 = vmatpush1.bf16.msra.mxu1 %v1546_v54  ;;  %755 = vmatprep.mubr.bf16.mxu1 %v1856_v14 }
 0x13e   : > { %808 = vmatprep.mubr.bf16.mxu0 %v1856_v14  ;;  %833 = vmatprep.subr.bf16.mxu1 %v1551_v55 }
 0x141   : > { %834 = vmatpush1.bf16.msra.mxu1 %v1549_v56 }
 0x144   : > { %1370 = vmatmul.mubr.msk.bf16.gmra.mxu1 %vm341_vm0, %v426_v53  ;;  %1372 = vmatmul.mubr.msk.bf16.gmra.mxu0 %vm341_vm0, %v426_v53 }
 0x145   : > { %851 = vmatprep.mubr.bf16.mxu1 %v1856_v14 }
 0x14c   : > { %1373 = vmatmul.mubr.msk.bf16.vlgmr.msra.gmra.mxu1 %vm341_vm0, %v425_v42 }
 0x14d   : > { %861 = vmatprep.mubr.bf16.mxu1 %v1856_v14 }
 0x154   : > { %1374 = vmatmul.mubr.msk.bf16.gmra.mxu1 %vm341_vm0, %v426_v53 }
 0x1ec   : > { %v641_v4 = vpop.f32.mrf.mxu1  ;;  %v694_v5 = vpop.f32.mrf.mxu0 }
 0x1ed   : > { %v2058_v6 = vadd.f32 %v641_v4, %v454_v0  ;;  %v2060_v7 = vadd.f32 %v694_v5, %v462_v1 }
 0x1ee   : > { %v643_v8 = vpop.f32.mrf.mxu1  ;;  %v696_v9 = vpop.f32.mrf.mxu0 }
 0x1ef   : > { %v1375_v10 = vmul.f32 -1.442695, %v2058_v6  ;;  %v1377_v11 = vmul.f32 -1.442695, %v2060_v7  ;;  %v2064_v12 = vadd.f32 %v643_v8, %v458_v2  ;;  %v2066_v13 = vadd.f32 %v696_v9, %v466_v3 }
 0x1f0   : > { %v645_v14 = vpop.f32.mrf.mxu1  ;;  %v698_v15 = vpop.f32.mrf.mxu0  ;;  %v473_v9 = vsub.s32 5, %v2039_v58 }
 0x1f1   : > { %1568 = vpow2.f32 %v1375_v10  ;;  %v1376_v16 = vmul.f32 -1.442695, %v2064_v12  ;;  %v1378_v17 = vmul.f32 -1.442695, %v2066_v13  ;;  %v2070_v18 = vadd.f32 %v645_v14, %v454_v0 }
 0x1f2   : > { %1570 = vpow2.f32 %v1377_v11  ;;  %v2072_v19 = vadd.f32 %v698_v15, %v462_v1  ;;  %v647_v20 = vpop.f32.mrf.mxu1  ;;  %v700_v21 = vpop.f32.mrf.mxu0  ;;  %v481_v14 = vsub.s32 7, %v2039_v58 }
 0x1f3   : > { %1572 = vpow2.f32 %v1376_v16  ;;  %v1385_v22 = vmul.f32 -1.442695, %v2070_v18  ;;  %v2075_v23 = vadd.f32 %v647_v20, %v458_v2  ;;  %v2077_v24 = vadd.f32 %v700_v21, %v466_v3 }
 0x1f4   : > { %1574 = vpow2.f32 %v1378_v17  ;;  %v1387_v25 = vmul.f32 -1.442695, %v2072_v19  ;;  %v651_v26 = vpop.f32.mrf.mxu1  ;;  %v704_v27 = vpop.f32.mrf.mxu0 }
 0x1f5   : > { %1576 = vpow2.f32 %v1385_v22  ;;  %v1386_v28 = vmul.f32 -1.442695, %v2075_v23  ;;  %v1388_v29 = vmul.f32 -1.442695, %v2077_v24  ;;  %v2082_v30 = vadd.f32 %v651_v26, %v454_v0 }
 0x1f6   : > { %1578 = vpow2.f32 %v1387_v25  ;;  %v2084_v31 = vadd.f32 %v704_v27, %v462_v1  ;;  %v653_v32 = vpop.f32.mrf.mxu1  ;;  %v706_v33 = vpop.f32.mrf.mxu0 }
 0x1f7   : > { %1580 = vpow2.f32 %v1386_v28  ;;  %v1395_v34 = vmul.f32 -1.442695, %v2082_v30  ;;  %v2087_v35 = vadd.f32 %v653_v32, %v458_v2  ;;  %v2089_v36 = vadd.f32 %v706_v33, %v466_v3 }
 0x1f8   : > { %1582 = vpow2.f32 %v1388_v29  ;;  %v1397_v37 = vmul.f32 -1.442695, %v2084_v31  ;;  %v655_v38 = vpop.f32.mrf.mxu1  ;;  %v708_v39 = vpop.f32.mrf.mxu0  ;;  %v2119_v33 = vrot.slane %v2046_v61, %v473_v9 }
 0x1f9   : > { %1584 = vpow2.f32 %v1395_v34  ;;  %v1396_v40 = vmul.f32 -1.442695, %v2087_v35  ;;  %v1398_v41 = vmul.f32 -1.442695, %v2089_v36  ;;  %v2094_v42 = vadd.f32 %v655_v38, %v454_v0 }
 0x1fa   : > { %1586 = vpow2.f32 %v1397_v37  ;;  %v2096_v43 = vadd.f32 %v708_v39, %v462_v1  ;;  %v657_v44 = vpop.f32.mrf.mxu1  ;;  %v710_v45 = vpop.f32.mrf.mxu0  ;;  %v469_v1 = vsub.s32 4, %v2039_v58  ;;  %v482_v38 = vrot.slane %v2046_v61, %v481_v14 }
 0x1fb   : > { %1588 = vpow2.f32 %v1396_v40  ;;  %v1405_v46 = vmul.f32 -1.442695, %v2094_v42  ;;  %v2099_v47 = vadd.f32 %v657_v44, %v458_v2  ;;  %v2101_v48 = vadd.f32 %v710_v45, %v466_v3 }
 0x1fc   : > { %1590 = vpow2.f32 %v1398_v41  ;;  %v1407_v49 = vmul.f32 -1.442695, %v2096_v43  ;;  %v747_v50 = vpop.f32.mrf.mxu1  ;;  %v800_v51 = vpop.f32.mrf.mxu0  ;;  %v477_v2 = vsub.s32 6, %v2039_v58  ;;  %v2113_v25 = vrot.slane %v2046_v61, %v469_v1 }
 0x1fd   : > { %1592 = vpow2.f32 %v1405_v46  ;;  %v1406_v52 = vmul.f32 -1.442695, %v2099_v47  ;;  %v1408_v53 = vmul.f32 -1.442695, %v2101_v48 }
 0x1fe   : > { %v1569_v54 = vpop.eup %1568  ;;  %1594 = vpow2.f32 %v1407_v49  ;;  %v749_v55 = vpop.f32.mrf.mxu1  ;;  %v2116_v26 = vrot.slane %v2046_v61, %v477_v2  ;;  %v2123_v49 = vadd.f32 %v747_v50, %v2113_v25 }
 0x1ff   : > { %v802_v56 = vpop.f32.mrf.mxu0  ;;  %v1571_v57 = vpop.eup %1570  ;;  %v992_v60 = vadd.f32 1.0, %v1569_v54  ;;  %1596 = vpow2.f32 %v1406_v52 }
 0x200   : > { %v1573_v63 = vpop.eup %1572  ;;  %v994_v0 = vadd.f32 1.0, %v1571_v57  ;;  %1598 = vpow2.f32 %v1408_v53  ;;  %v751_v3 = vpop.f32.mrf.mxu1  ;;  %v2126_v52 = vadd.f32 %v800_v51, %v2116_v26  ;;  %v2129_v57 = vadd.f32 %v749_v55, %v2119_v33 }
 0x201   : > { %v2108_v4 = vpop.f32.mrf.mxu0  ;;  %v1575_v5 = vpop.eup %1574  ;;  %1600 = vrcp.f32 %v992_v60  ;;  %v993_v8 = vadd.f32 1.0, %v1573_v63  ;;  %v2137_v14 = vadd.f32 %v751_v3, %v2113_v25 }
 0x202   : > { %v1577_v10 = vpop.eup %1576  ;;  %1602 = vrcp.f32 %v994_v0  ;;  %v995_v11 = vadd.f32 1.0, %v1575_v5  ;;  %v753_v15 = vpop.f32.mrf.mxu1  ;;  %v2131_v0 = vadd.f32 %v802_v56, %v482_v38  ;;  %v1381_v9 = vmul.f32 -1.442695, %v2126_v52 }
 0x203   : > { %v806_v16 = vpop.f32.mrf.mxu0  ;;  %v1579_v17 = vpop.eup %1578  ;;  %1604 = vrcp.f32 %v993_v8  ;;  %v1002_v20 = vadd.f32 1.0, %v1577_v10  ;;  %v1379_v8 = vmul.f32 -1.442695, %v2123_v49 }
 0x204   : > { %v1581_v21 = vpop.eup %1580  ;;  %1606 = vrcp.f32 %v995_v11  ;;  %v1004_v22 = vadd.f32 1.0, %v1579_v17  ;;  %v757_v27 = vpop.f32.mrf.mxu1  ;;  %v1380_v11 = vmul.f32 -1.442695, %v2129_v57 }
 0x205   : > { %v810_v28 = vpop.f32.mrf.mxu0  ;;  %v1583_v29 = vpop.eup %1582  ;;  %1608 = vrcp.f32 %v1002_v20  ;;  %v1003_v32 = vadd.f32 1.0, %v1581_v21  ;;  %v1382_v21 = vmul.f32 -1.442695, %v2131_v0  ;;  %v2150_v3 = vadd.f32 %v757_v27, %v2113_v25 }
 0x206   : > { %v1585_v34 = vpop.eup %1584  ;;  %1610 = vrcp.f32 %v1004_v22  ;;  %v1005_v37 = vadd.f32 1.0, %v1583_v29  ;;  %v759_v39 = vpop.f32.mrf.mxu1  ;;  %v2142_v22 = vadd.f32 %v2108_v4, %v2116_v26 }
 0x207   : > { %v1587_v40 = vpop.eup %1586  ;;  %1612 = vrcp.f32 %v1003_v32  ;;  %v1012_v41 = vadd.f32 1.0, %v1585_v34  ;;  %v812_v44 = vpop.f32.mrf.mxu0  ;;  %v2145_v32 = vadd.f32 %v753_v15, %v2119_v33  ;;  %v2147_v34 = vadd.f32 %v806_v16, %v482_v38 }
 0x208   : > { %v1589_v45 = vpop.eup %1588  ;;  %1614 = vrcp.f32 %v1005_v37  ;;  %v1014_v46 = vadd.f32 1.0, %v1587_v40  ;;  %v761_v61 = vpop.f32.mrf.mxu1  ;;  %v2158_v4 = vadd.f32 %v812_v44, %v482_v38  ;;  %v1389_v15 = vmul.f32 -1.442695, %v2137_v14 }
 0x209   : > { %v1591_v53 = vpop.eup %1590  ;;  %1616 = vrcp.f32 %v1012_v41  ;;  %v1013_v54 = vadd.f32 1.0, %v1589_v45  ;;  %v814_v50 = vpop.f32.mrf.mxu0  ;;  %v2153_v41 = vadd.f32 %v810_v28, %v2116_v26  ;;  %v2156_v45 = vadd.f32 %v759_v39, %v2119_v33 }
 0x20a   : > { %v1593_v60 = vpop.eup %1592  ;;  %1618 = vrcp.f32 %v1014_v46  ;;  %v1015_v63 = vadd.f32 1.0, %v1591_v53  ;;  %v763_v56 = vpop.f32.mrf.mxu1  ;;  %v2162_v16 = vadd.f32 %v761_v61, %v2113_v25  ;;  %v2165_v27 = vadd.f32 %v814_v50, %v2116_v26 }
 0x20b   : > { %v1595_v1 = vpop.eup %1594  ;;  %1620 = vrcp.f32 %v1013_v54  ;;  %v1022_v2 = vadd.f32 1.0, %v1593_v60  ;;  %v816_v37 = vpop.f32.mrf.mxu0  ;;  %v1391_v28 = vmul.f32 -1.442695, %v2142_v22  ;;  %v2171_v39 = vadd.f32 %v763_v56, %v2119_v33 }
 0x20c   : > { %v1597_v5 = vpop.eup %1596  ;;  %1622 = vrcp.f32 %v1015_v63  ;;  %v1024_v51 = vadd.f32 1.0, %v1595_v1  ;;  %v2167_v53 = vpop.f32.mrf.mxu1  ;;  %v2173_v44 = vadd.f32 %v816_v37, %v482_v38  ;;  %v1390_v63 = vmul.f32 -1.442695, %v2145_v32 }
 0x20d   : > { %v1599_v10 = vpop.eup %1598  ;;  %1624 = vrcp.f32 %v1022_v2  ;;  %v1023_v55 = vadd.f32 1.0, %v1597_v5  ;;  %v1392_v25 = vmul.f32 -1.442695, %v2147_v34  ;;  %v1399_v26 = vmul.f32 -1.442695, %v2150_v3 }
 0x20e   : > { %v1601_v17 = vpop.eup %1600  ;;  %1626 = vrcp.f32 %v1024_v51  ;;  %v1025_v20 = vadd.f32 1.0, %v1599_v10  ;;  %v1401_v1 = vmul.f32 -1.442695, %v2153_v41  ;;  %v1400_v2 = vmul.f32 -1.442695, %v2156_v45 }
 0x20f   : > { %v1603_v29 = vpop.eup %1602  ;;  %1628 = vrcp.f32 %v1023_v55  ;;  %v1402_v50 = vmul.f32 -1.442695, %v2158_v4  ;;  %v1409_v5 = vmul.f32 -1.442695, %v2162_v16  ;;  %v1411_v51 = vmul.f32 -1.442695, %v2165_v27 }
 0x210   : > { %v1605_v40 = vpop.eup %1604  ;;  %1630 = vrcp.f32 %v1025_v20  ;;  %v1410_v55 = vmul.f32 -1.442695, %v2171_v39  ;;  %v1112_v20 = vmul.f32 %v1601_v17, %v2058_v6 }
 0x211   : > { %v1607_v46 = vpop.eup %1606  ;;  %1632 = vpow2.f32 %v1379_v8  ;;  %v2184_v8 = vpop.f32.mrf.mxu1 }
 0x212   : > { %v1609_v54 = vpop.eup %1608  ;;  %1634 = vpow2.f32 %v1381_v9 }
 0x213   : > { %v1611_v60 = vpop.eup %1610  ;;  %1636 = vpow2.f32 %v1380_v11  ;;  %v1122_v38 = vmul.f32 %v1609_v54, %v2070_v18  ;;  %v1412_v11 = vmul.f32 -1.442695, %v2173_v44  ;;  %v2197_v6 = vpop.f32.mrf.mxu1 }
 0x214   : > { %v1613_v61 = vpop.eup %1612  ;;  %1638 = vpow2.f32 %v1382_v21  ;;  %v1124_v10 = vmul.f32 %v1611_v60, %v2072_v19  ;;  %v1113_v60 = vmul.f32 %v1605_v40, %v2064_v12 }
 0x215   : > { %v1615_v33 = vpop.eup %1614  ;;  %1640 = vpow2.f32 %v1389_v15  ;;  %v1123_v18 = vmul.f32 %v1613_v61, %v2075_v23  ;;  %v1114_v15 = vmul.f32 %v1603_v29, %v2060_v7  ;;  %v1162_v62 = vadd.f32 %v1122_v38, %v1112_v20  ;;  %v1154_v61 = vld [vmem:[%s1995_s26 + $0x10] sm:$0xff]  ;;  %v1153_v38 = vld [vmem:[%s1995_s26 + $0x8] sm:$0xff] }
 0x216   : > { %v1617_v9 = vpop.eup %1616  ;;  %1642 = vpow2.f32 %v1391_v28  ;;  %v1125_v54 = vmul.f32 %v1615_v33, %v2077_v24 }
 0x217   : > { %v1619_v56 = vpop.eup %1618  ;;  %v1132_v21 = vmul.f32 %v1617_v9, %v2082_v30  ;;  %1644 = vpow2.f32 %v1390_v63  ;;  %v1115_v30 = vmul.f32 %v1607_v46, %v2066_v13  ;;  %v1168_v17 = vadd.f32 %v1124_v10, %v1114_v15 }
 0x218   : > { %v1621_v37 = vpop.eup %1620  ;;  %v1134_v19 = vmul.f32 %v1619_v56, %v2084_v31  ;;  %1646 = vpow2.f32 %v1392_v25  ;;  %v1165_v31 = vadd.f32 %v1123_v18, %v1113_v60  ;;  %v1152_v25 = vld [vmem:[%s1995_s26] sm:$0xff] }
 0x219   : > { %v1623_v28 = vpop.eup %1622  ;;  %v1133_v59 = vmul.f32 %v1621_v37, %v2087_v35  ;;  %1648 = vpow2.f32 %v1399_v26  ;;  %v1163_v29 = vadd.f32 %v1162_v62, %v1132_v21  ;;  %v1171_v35 = vadd.f32 %v1125_v54, %v1115_v30  ;;  %v2206_v62 = vpop.f32.mrf.mxu1 }
 0x21a   : > { %v1625_v23 = vpop.eup %1624  ;;  %v1135_v7 = vmul.f32 %v1623_v28, %v2089_v36  ;;  %1650 = vpow2.f32 %v1401_v1  ;;  %v1169_v63 = vadd.f32 %v1168_v17, %v1134_v19 }
 0x21b   : > { %v1627_v24 = vpop.eup %1626  ;;  %v1142_v12 = vmul.f32 %v1625_v23, %v2094_v42  ;;  %1652 = vpow2.f32 %v1400_v2  ;;  %v1166_v46 = vadd.f32 %v1165_v31, %v1133_v59  ;;  %v1155_v59 = vld [vmem:[%s1995_s26 + $0x18] sm:$0xff] }
 0x21c   : > { %v1629_v40 = vpop.eup %1628  ;;  %v1144_v26 = vmul.f32 %v1627_v24, %v2096_v43  ;;  %1654 = vpow2.f32 %v1402_v50  ;;  %v1172_v2 = vadd.f32 %v1171_v35, %v1135_v7  ;;  %v2352_v7 = vsub.s32 0, %v2039_v58 }
 0x21d   : > { %v1631_v13 = vpop.eup %1630  ;;  %v1164_v36 = vadd.f32 %v1163_v29, %v1142_v12  ;;  %v1143_v1 = vmul.f32 %v1629_v40, %v2099_v47  ;;  %1656 = vpow2.f32 %v1409_v5  ;;  %v2353_v40 = vsub.s32 1, %v2039_v58 }
 0x21e   : > { %v1633_v42 = vpop.eup %1632  ;;  %v1170_v33 = vadd.f32 %v1169_v63, %v1144_v26  ;;  %v1145_v9 = vmul.f32 %v1631_v13, %v2101_v48  ;;  %1658 = vpow2.f32 %v1411_v51  ;;  %v863_v51 = vpop.f32.mrf.mxu1 }
 0x21f   : > { %v1635_v43 = vpop.eup %1634  ;;  %v1192_v50 = vadd.f32 %v1164_v36, %v1152_v25  ;;  %v1167_v10 = vadd.f32 %v1166_v46, %v1143_v1  ;;  %v996_v56 = vadd.f32 1.0, %v1633_v42  ;;  %1660 = vpow2.f32 %v1410_v55  ;;  %v448_v55 = vld [vmem:[%s2343_s4 + $0x8] sm:$0x3] }
 0x220   : > { %v1637_v20 = vpop.eup %1636  ;;  %v1194_v47 = vadd.f32 %v1170_v33, %v1154_v61  ;;  %v1173_v5 = vadd.f32 %v1172_v2, %v1145_v9  ;;  %v998_v18 = vadd.f32 1.0, %v1635_v43  ;;  %1662 = vpow2.f32 %v1412_v11  ;;  %v865_v31 = vpop.f32.mrf.mxu1 }
 0x221   : > { %v1639_v21 = vpop.eup %1638  ;;  %1202 = vst [vmem:[%s1995_s26] sm:$0xff] %v1192_v50  ;;  %v1193_v37 = vadd.f32 %v1167_v10, %v1153_v38  ;;  %1664 = vrcp.f32 %v996_v56  ;;  %v997_v48 = vadd.f32 1.0, %v1637_v20  ;;  %v486_v24 = vrot.slane %v448_v55, %v2352_v7 }
 0x222   : > { %v1641_v15 = vpop.eup %1640  ;;  %1204 = vst [vmem:[%s1995_s26 + $0x10] sm:$0xff] %v1194_v47  ;;  %v1195_v54 = vadd.f32 %v1173_v5, %v1155_v59  ;;  %1666 = vrcp.f32 %v998_v18  ;;  %v999_v19 = vadd.f32 1.0, %v1639_v21  ;;  %v490_v35 = vrot.slane %v448_v55, %v2353_v40  ;;  %v867_v1 = vpop.f32.mrf.mxu1 }
 0x223   : > { %v1643_v28 = vpop.eup %1642  ;;  %1203 = vst [vmem:[%s1995_s26 + $0x8] sm:$0xff] %v1193_v37  ;;  %1668 = vrcp.f32 %v997_v48  ;;  %v1006_v11 = vadd.f32 1.0, %v1641_v15  ;;  %v2223_v61 = vadd.f32 %v2167_v53, %v486_v24  ;;  %v2229_v9 = vadd.f32 %v2197_v6, %v486_v24 }
 0x224   : > { %v1645_v60 = vpop.eup %1644  ;;  %1205 = vst [vmem:[%s1995_s26 + $0x18] sm:$0xff] %v1195_v54  ;;  %1670 = vrcp.f32 %v999_v19  ;;  %v1008_v23 = vadd.f32 1.0, %v1643_v28  ;;  %v2226_v33 = vadd.f32 %v2184_v8, %v490_v35  ;;  %v2232_v10 = vadd.f32 %v2206_v62, %v490_v35  ;;  %v869_v8 = vpop.f32.mrf.mxu1 }
 0x225   : > { %v1647_v30 = vpop.eup %1646  ;;  %1672 = vrcp.f32 %v1006_v11  ;;  %v1007_v17 = vadd.f32 1.0, %v1645_v60  ;;  %v1383_v56 = vmul.f32 -1.442695, %v2223_v61  ;;  %v2235_v20 = vadd.f32 %v863_v51, %v486_v24 }
 0x226   : > { %v1649_v29 = vpop.eup %1648  ;;  %1674 = vrcp.f32 %v1008_v23  ;;  %v1009_v12 = vadd.f32 1.0, %v1647_v30  ;;  %v1384_v6 = vmul.f32 -1.442695, %v2226_v33  ;;  %v2238_v18 = vadd.f32 %v865_v31, %v490_v35 }
 0x227   : > { %v1651_v63 = vpop.eup %1650  ;;  %1676 = vrcp.f32 %v1007_v17  ;;  %v1016_v25 = vadd.f32 1.0, %v1649_v29  ;;  %v1393_v62 = vmul.f32 -1.442695, %v2229_v9  ;;  %v2241_v37 = vadd.f32 %v867_v1, %v486_v24 }
 0x228   : > { %v1653_v26 = vpop.eup %1652  ;;  %1678 = vrcp.f32 %v1009_v12  ;;  %v1018_v13 = vadd.f32 1.0, %v1651_v63  ;;  %v1394_v15 = vmul.f32 -1.442695, %v2232_v10  ;;  %v2244_v51 = vadd.f32 %v869_v8, %v490_v35 }
 0x229   : > { %v1655_v46 = vpop.eup %1654  ;;  %1680 = vrcp.f32 %v1016_v25  ;;  %v1017_v36 = vadd.f32 1.0, %v1653_v26  ;;  %v1403_v19 = vmul.f32 -1.442695, %v2235_v20  ;;  %v1404_v28 = vmul.f32 -1.442695, %v2238_v18 }
 0x22a   : > { %v1657_v42 = vpop.eup %1656  ;;  %1682 = vrcp.f32 %v1018_v13  ;;  %v1019_v2 = vadd.f32 1.0, %v1655_v46  ;;  %v1413_v60 = vmul.f32 -1.442695, %v2241_v37  ;;  %v1414_v30 = vmul.f32 -1.442695, %v2244_v51 }
 0x22b   : > { %v1659_v58 = vpop.eup %1658  ;;  %1684 = vrcp.f32 %v1017_v36  ;;  %v1026_v38 = vadd.f32 1.0, %v1657_v42 }
 0x22c   : > { %v1661_v43 = vpop.eup %1660  ;;  %1686 = vrcp.f32 %v1019_v2  ;;  %v1028_v50 = vadd.f32 1.0, %v1659_v58 }
 0x22d   : > { %v1663_v53 = vpop.eup %1662  ;;  %1688 = vrcp.f32 %v1026_v38  ;;  %v1027_v59 = vadd.f32 1.0, %v1661_v43 }
 0x22e   : > { %v1665_v47 = vpop.eup %1664  ;;  %1690 = vrcp.f32 %v1028_v50  ;;  %v1029_v5 = vadd.f32 1.0, %v1663_v53 }
 0x22f   : > { %v1667_v21 = vpop.eup %1666  ;;  %1692 = vrcp.f32 %v1027_v59  ;;  %v1116_v12 = vmul.f32 %v1665_v47, %v2123_v49  ;;  %v1157_v47 = vld [vmem:[%s1995_s26 + $0x28] sm:$0xff] }
 0x230   : > { %v1669_v48 = vpop.eup %1668  ;;  %1694 = vrcp.f32 %v1029_v5  ;;  %v1118_v25 = vmul.f32 %v1667_v21, %v2126_v52 }
 0x231   : > { %v1671_v54 = vpop.eup %1670  ;;  %1696 = vpow2.f32 %v1383_v56 }
 0x232   : > { %v1673_v55 = vpop.eup %1672  ;;  %1698 = vpow2.f32 %v1384_v6 }
 0x233   : > { %v1675_v11 = vpop.eup %1674  ;;  %1700 = vpow2.f32 %v1393_v62  ;;  %v1126_v7 = vmul.f32 %v1673_v55, %v2137_v14  ;;  %v1159_v62 = vld [vmem:[%s1995_s26 + $0x38] sm:$0xff] }
 0x234   : > { %v1677_v23 = vpop.eup %1676  ;;  %1702 = vpow2.f32 %v1394_v15  ;;  %v1128_v31 = vmul.f32 %v1675_v11, %v2142_v22  ;;  %v1117_v22 = vmul.f32 %v1669_v48, %v2129_v57  ;;  %v1156_v57 = vld [vmem:[%s1995_s26 + $0x20] sm:$0xff] }
 0x235   : > { %v1679_v17 = vpop.eup %1678  ;;  %1704 = vpow2.f32 %v1403_v19  ;;  %v1127_v40 = vmul.f32 %v1677_v23, %v2145_v32  ;;  %v1174_v46 = vadd.f32 %v1126_v7, %v1116_v12  ;;  %v1119_v32 = vmul.f32 %v1671_v54, %v2131_v0  ;;  %v1158_v0 = vld [vmem:[%s1995_s26 + $0x30] sm:$0xff] }
 0x236   : > { %v1681_v24 = vpop.eup %1680  ;;  %1706 = vpow2.f32 %v1404_v28  ;;  %v1129_v26 = vmul.f32 %v1679_v17, %v2147_v34 }
 0x237   : > { %v1683_v29 = vpop.eup %1682  ;;  %v1136_v35 = vmul.f32 %v1681_v24, %v2150_v3  ;;  %1708 = vpow2.f32 %v1413_v60  ;;  %v1180_v3 = vadd.f32 %v1128_v31, %v1118_v25  ;;  %v1177_v42 = vadd.f32 %v1127_v40, %v1117_v22 }
 0x238   : > { %v1685_v63 = vpop.eup %1684  ;;  %v1138_v14 = vmul.f32 %v1683_v29, %v2153_v41  ;;  %1710 = vpow2.f32 %v1414_v30  ;;  %v1183_v58 = vadd.f32 %v1129_v26, %v1119_v32 }
 0x239   : > { %v1687_v13 = vpop.eup %1686  ;;  %v1137_v49 = vmul.f32 %v1685_v63, %v2156_v45  ;;  %v1175_v34 = vadd.f32 %v1174_v46, %v1136_v35 }
 0x23a   : > { %v1689_v36 = vpop.eup %1688  ;;  %v1139_v1 = vmul.f32 %v1687_v13, %v2158_v4  ;;  %v1181_v38 = vadd.f32 %v1180_v3, %v1138_v14 }
 0x23b   : > { %v1691_v52 = vpop.eup %1690  ;;  %v1146_v41 = vmul.f32 %v1689_v36, %v2162_v16  ;;  %v1178_v50 = vadd.f32 %v1177_v42, %v1137_v49  ;;  %v1160_v42 = vld [vmem:[%s1995_s26 + $0x40] sm:$0xff] }
 0x23c   : > { %v1693_v2 = vpop.eup %1692  ;;  %v1148_v45 = vmul.f32 %v1691_v52, %v2165_v27  ;;  %v1184_v56 = vadd.f32 %v1183_v58, %v1139_v1 }
 0x23d   : > { %v1695_v43 = vpop.eup %1694  ;;  %v1176_v53 = vadd.f32 %v1175_v34, %v1146_v41  ;;  %v1147_v59 = vmul.f32 %v1693_v2, %v2171_v39  ;;  %v1161_v41 = vld [vmem:[%s1995_s26 + $0x48] sm:$0xff] }
 0x23e   : > { %v1697_v4 = vpop.eup %1696  ;;  %v1182_v8 = vadd.f32 %v1181_v38, %v1148_v45  ;;  %v1149_v16 = vmul.f32 %v1695_v43, %v2173_v44 }
 0x23f   : > { %v1699_v5 = vpop.eup %1698  ;;  %v1196_v6 = vadd.f32 %v1176_v53, %v1156_v57  ;;  %v1179_v21 = vadd.f32 %v1178_v50, %v1147_v59  ;;  %v1000_v48 = vadd.f32 1.0, %v1697_v4 }
 0x240   : > { %v1701_v27 = vpop.eup %1700  ;;  %v1198_v15 = vadd.f32 %v1182_v8, %v1158_v0  ;;  %v1185_v54 = vadd.f32 %v1184_v56, %v1149_v16  ;;  %v1001_v19 = vadd.f32 1.0, %v1699_v5 }
 0x241   : > { %v1703_v39 = vpop.eup %1702  ;;  %1206 = vst [vmem:[%s1995_s26 + $0x20] sm:$0xff] %v1196_v6  ;;  %v1197_v55 = vadd.f32 %v1179_v21, %v1157_v47  ;;  %1712 = vrcp.f32 %v1000_v48  ;;  %v1010_v28 = vadd.f32 1.0, %v1701_v27 }
 0x242   : > { %v1705_v11 = vpop.eup %1704  ;;  %1208 = vst [vmem:[%s1995_s26 + $0x30] sm:$0xff] %v1198_v15  ;;  %v1199_v44 = vadd.f32 %v1185_v54, %v1159_v62  ;;  %1714 = vrcp.f32 %v1001_v19  ;;  %v1011_v60 = vadd.f32 1.0, %v1703_v39 }
 0x243   : > { %v1707_v23 = vpop.eup %1706  ;;  %1207 = vst [vmem:[%s1995_s26 + $0x28] sm:$0xff] %v1197_v55  ;;  %1716 = vrcp.f32 %v1010_v28  ;;  %v1020_v30 = vadd.f32 1.0, %v1705_v11 }
 0x244   : > { %v1709_v17 = vpop.eup %1708  ;;  %1209 = vst [vmem:[%s1995_s26 + $0x38] sm:$0xff] %v1199_v44  ;;  %1718 = vrcp.f32 %v1011_v60  ;;  %v1021_v7 = vadd.f32 1.0, %v1707_v23 }
 0x245   : > { %v1711_v24 = vpop.eup %1710  ;;  %1720 = vrcp.f32 %v1020_v30  ;;  %v1030_v31 = vadd.f32 1.0, %v1709_v17 }
 0x246   : > { %1722 = vrcp.f32 %v1021_v7  ;;  %v1031_v29 = vadd.f32 1.0, %v1711_v24 }
 0x247   : > { %1724 = vrcp.f32 %v1030_v31 }
 0x248   : > { %1726 = vrcp.f32 %v1031_v29 }
 0x24e   : > { %v1713_v12 = vpop.eup %1712 }
 0x24f   : > { %v1715_v40 = vpop.eup %1714  ;;  %v1120_v25 = vmul.f32 %v1713_v12, %v2223_v61 }
 0x250   : > { %v1717_v35 = vpop.eup %1716  ;;  %v1121_v13 = vmul.f32 %v1715_v40, %v2226_v33 }
 0x251   : > { %v1719_v63 = vpop.eup %1718  ;;  %v1130_v26 = vmul.f32 %v1717_v35, %v2229_v9 }
 0x252   : > { %v1721_v14 = vpop.eup %1720  ;;  %v1131_v22 = vmul.f32 %v1719_v63, %v2232_v10 }
 0x253   : > { %v1723_v46 = vpop.eup %1722  ;;  %v1186_v49 = vadd.f32 %v1130_v26, %v1120_v25  ;;  %v1140_v36 = vmul.f32 %v1721_v14, %v2235_v20 }
 0x254   : > { %v1725_v32 = vpop.eup %1724  ;;  %v1189_v3 = vadd.f32 %v1131_v22, %v1121_v13  ;;  %v1141_v1 = vmul.f32 %v1723_v46, %v2238_v18 }
 0x255   : > { %v1727_v61 = vpop.eup %1726  ;;  %v1187_v9 = vadd.f32 %v1186_v49, %v1140_v36  ;;  %v1150_v52 = vmul.f32 %v1725_v32, %v2241_v37 }
 0x256   : > { %v1190_v33 = vadd.f32 %v1189_v3, %v1141_v1  ;;  %v1151_v10 = vmul.f32 %v1727_v61, %v2244_v51 }
 0x257   : > { %v1188_v34 = vadd.f32 %v1187_v9, %v1150_v52 }
 0x258   : > { %v1191_v20 = vadd.f32 %v1190_v33, %v1151_v10 }
 0x259   : > { %v1200_v2 = vadd.f32 %v1188_v34, %v1160_v42 }
 0x25a   : > { %v1201_v58 = vadd.f32 %v1191_v20, %v1161_v41 }
 0x25b   : > { %1210 = vst [vmem:[%s1995_s26 + $0x40] sm:$0xff] %v1200_v2 }
 0x25c   : > { %1211 = vst [vmem:[%s1995_s26 + $0x48] sm:$0xff] %v1201_v58 }
 0x25d   : > { %1767 = shalt.err (!%p1764_p7)
}
 0x25e   : > { %s1768_s26 = scalar_lea.hbm %s2289_s12, 1280  ;;  %s1772_s17 = scalar_lea.hbm %s2344_s5, 2560 }
 0x25f   : > { %p1769_p8 = scmp.ne.s32.totalorder %s2289_s12, %s1768_s26  ;;  %p1773_p0 = scmp.lt.s32.totalorder %s2289_s12, %s2344_s5 }
 0x260   : > { %p1774_p10 = scmp.lt.s32.totalorder %s1772_s17, %s1768_s26 }
 0x261   : > { %p1770_p11 = pnand %p1769_p8, %p1938_p3 }
 0x262   : > { %p1775_p13 = por %p1774_p10, %p1773_p0 }
 0x263   : > { %p1771_p12 = pneg %p1770_p11 }
 0x265   : > { %p1776_p1 = pnand %p1775_p13, %p1771_p12 }
 0x267   : > { %1779 = shalt.err (!%p1776_p1)
}
 0x268   : > { %1436 = dma.vmem_to_hbm [thread:$0]  (%p1938_p3), %s1230_s21, 1280, %s2289_s12, %s1213_s13  }
 0x269 PF: > { %p1448_p2 = scmp.ge.s32.totalorder %s1850_s25, 2  ;;  %s1241_s9 = sand.u32 1, %s1822_s18  }
 0x26a   : > { %s1242_s8 = scalar_lea.sflag [#allocation4], %s1241_s9 }
 0x26b   : > { %p1443_p4 = pnand %p1448_p2, %p1948_p9 }
 0x26d   : > { %p1444_p5 = pneg %p1443_p4 }
 0x26f   : > { %1817 = dma.done.wait (%p1444_p5), %s1242_s8, 1280  }
 0x270   : > { %1819 = vsyncadd (%p1444_p5), %s1242_s8, 4294966016  ;;  %s19_s25 = sadd.s32 1, %s1850_s25   ;;  %s2354_s18 = smov %s1826_s19 }
 0x271   : > { %p16_p6 = scmp.ge.s32.totalorder %s19_s25, 6   ;;  %s2355_s19 = smov %s1830_s20 }
 0x272   : > { %s2356_s20 = smov %s1965_s11  ;;  %s2357_s21 = smov %s1842_s23 }
 0x273   : > { %s2358_s22 = smov %s1846_s24  ;;  %s2359_s23 = smov %s2362_s28 }
 0x274   : > { %s2360_s24 = smov %s2366_s29  ;;  %18 = sbr.rel (!%p16_p6) target bundleno = 6 (0x6), region = 84 }
 0x279   :  { %1247 = vsyncpa [#allocation3], 1 }
 0x27a   :  { %1249 = vsyncpa [#allocation3 + $0x1], 1 }
 0x27b   :  { %1250 = vsyncpa [#allocation4], 1 }
 0x27c   :  { %1252 = vsyncpa [#allocation4 + $0x1], 1 }

</bundles_post_ra>
